<compile_context>
chip_gen: v5e
topology: v5e:2x2
jax: 0.10.0
libtpu: 0.0.40
codegen_flags: <defaults>
</compile_context>

<pallas_src>
import jax
import jax.numpy as jnp
from jax.experimental import pallas as pl
from jax.experimental.pallas import tpu as pltpu


def _round_up(x: int, m: int) -> int:
    return ((x + m - 1) // m) * m


def _choose_batch_tile(batch, k, n_pad, vmem_budget_bytes=24 * 1024 * 1024):
    """Largest multiple-of-8 batch tile whose double-buffered tiles fit the budget."""
    resident = 2 * 4 * (n_pad * k + n_pad)      # weights + bias blocks (x2 buffers)
    per_row = 2 * 4 * (k + n_pad)               # x-tile + out-tile bytes per row (x2 buffers)
    avail = max(vmem_budget_bytes - resident, 8 * per_row)
    tb = min(512, avail // per_row, _round_up(batch, 8))
    return max(8, int(tb) // 8 * 8)


def _gating_kernel(x_ref, w_ref, b_ref, o_ref):
    # (TB, K) contracted with (N_pad, K) on K -> (TB, N_pad) on the MXU, f32 acc.
    logits = jax.lax.dot_general(
        x_ref[...],
        w_ref[...],
        dimension_numbers=(((1,), (1,)), ((), ())),
        preferred_element_type=jnp.float32,
    ) + b_ref[...]

    # Numerically-stable sigmoid on the EUP: exp + approximate reciprocal.
    e = jnp.exp(-jnp.abs(logits))
    numer = jnp.where(logits >= 0, jnp.ones_like(e), e)
    gates = numer * pl.reciprocal(1.0 + e, approx=True)
    o_ref[...] = gates.astype(o_ref.dtype)


def gating_network_forward(x, hyper_weights, hyper_bias):
    """x: (B, K); hyper_weights: (n_gates, K); hyper_bias: (n_gates,)."""
    B, K = x.shape
    n_gates = hyper_weights.shape[0]

    # Lane-dense N: pad the gate dim up to a multiple of 128 (sliced off below).
    n_pad = _round_up(max(n_gates, 1), 128)
    tb = _choose_batch_tile(B, K, n_pad)
    b_pad = _round_up(B, tb)

    x_p = x.astype(jnp.float32)
    if b_pad != B:
        x_p = jnp.pad(x_p, ((0, b_pad - B), (0, 0)))
    w_p = hyper_weights.astype(jnp.float32)
    bias_p = hyper_bias.astype(jnp.float32)
    if n_pad != n_gates:
        w_p = jnp.pad(w_p, ((0, n_pad - n_gates), (0, 0)))
        bias_p = jnp.pad(bias_p, ((0, n_pad - n_gates),))
    bias2d = bias_p.reshape(1, n_pad)

    grid = (pl.cdiv(b_pad, tb),)

    cost = pl.CostEstimate(
        flops=2 * b_pad * K * n_pad,
        transcendentals=b_pad * n_pad,
        bytes_accessed=4 * (b_pad * K + n_pad * K + b_pad * n_pad),
    )

    out = pl.pallas_call(
        _gating_kernel,
        out_shape=jax.ShapeDtypeStruct((b_pad, n_pad), jnp.float32),
        grid=grid,
        in_specs=[
            pl.BlockSpec((tb, K), lambda i: (i, 0)),       # x: streamed / double-buffered
            pl.BlockSpec((n_pad, K), lambda i: (0, 0)),    # weights: resident
            pl.BlockSpec((1, n_pad), lambda i: (0, 0)),    # bias: resident
        ],
        out_specs=pl.BlockSpec((tb, n_pad), lambda i: (i, 0)),
        compiler_params=pltpu.CompilerParams(
            dimension_semantics=("parallel",),             # shard batch tiles across TCs (v7x)
            vmem_limit_bytes=32 * 1024 * 1024,
        ),
        cost_estimate=cost,
    )(x_p, w_p, bias2d)

    return out[:B, :n_gates]


class GatingNetworkPallas:
    """Mirrors the PyTorch module's parameter bookkeeping in plain JAX."""

    def __init__(self, input_size, n_neurons, n_branches, branch_size, hidden_size=8):
        self.input_size = input_size
        self.n_neurons = n_neurons
        self.n_branches = n_branches
        self.branch_size = branch_size
        self.hidden_size = hidden_size
        self.n_gates = n_neurons * n_branches
        self.weight_size = input_size * self.n_gates
        self.bias_size = self.n_gates
        self.total_params = self.weight_size + self.bias_size
        self.hyper_weights = None
        self.hyper_bias = None

    def set_hypernetwork_outputs(self, weight_vector):
        self.hyper_weights = weight_vector[: self.weight_size].reshape(
            self.n_gates, self.input_size
        )
        self.hyper_bias = weight_vector[
            self.weight_size : self.weight_size + self.bias_size
        ]

    def forward(self, x):
        if self.hyper_weights is None or self.hyper_bias is None:
            # Matches torch: zero logits -> sigmoid(0) = 0.5 gates.
            return jnp.full((x.shape[0], self.n_gates), 0.5, dtype=jnp.float32)
        return gating_network_forward(x, self.hyper_weights, self.hyper_bias)


if __name__ == "__main__":
    # Small, module-consistent shapes.
    batch = 2
    input_size = 16
    n_neurons = 4
    n_branches = 2
    branch_size = 4

    net = GatingNetworkPallas(input_size, n_neurons, n_branches, branch_size)

    key = jax.random.PRNGKey(0)
    k_x, k_w = jax.random.split(key)
    x = jax.random.normal(k_x, (batch, input_size), dtype=jnp.float32)
    # Deterministic synthetic hypernetwork output vector (weights ++ bias).
    weight_vector = jax.random.normal(
        k_w, (net.total_params,), dtype=jnp.float32
    ) * 0.1

    net.set_hypernetwork_outputs(weight_vector)
    gates = jax.block_until_ready(net.forward(x))

    # Correctness check against plain-JAX reference of F.linear + sigmoid.
    ref = jax.nn.sigmoid(x @ net.hyper_weights.T + net.hyper_bias)
    assert gates.shape == (batch, net.n_gates)
    max_err = float(jnp.max(jnp.abs(gates - ref)))
    assert jnp.allclose(gates, ref, atol=2e-3, rtol=2e-3), max_err

    print("KERNEL_OK")
</pallas_src>

<mosaic_0001>
module attributes {stable_mosaic.version = 11 : i64} {
  func.func @_gating_kernel(%arg0: i32, %arg1: memref<8x16xf32, #tpu.memory_space<vmem>>, %arg2: memref<128x16xf32, #tpu.memory_space<vmem>>, %arg3: memref<1x128xf32, #tpu.memory_space<vmem>>, %arg4: memref<8x128xf32, #tpu.memory_space<vmem>>) attributes {dimension_semantics = [#tpu.dimension_semantics<parallel>], iteration_bounds = array<i64: 1>, scalar_prefetch = 0 : i64, scratch_operands = 0 : i64, tpu.core_type = #tpu.core_type<tc>, window_params = [{transform_indices = @transform_0, window_bounds = array<i64: 8, 16>}, {pipeline_mode = #tpu.pipeline_mode<synchronous>, transform_indices = @transform_1, window_bounds = array<i64: 128, 16>}, {pipeline_mode = #tpu.pipeline_mode<synchronous>, transform_indices = @transform_2, window_bounds = array<i64: 1, 128>}, {transform_indices = @transform_3, window_bounds = array<i64: 8, 128>}]} {
    %c0 = arith.constant 0 : index
    %c0_0 = arith.constant 0 : index
    %0 = vector.load %arg1[%c0, %c0_0] : memref<8x16xf32, #tpu.memory_space<vmem>>, vector<8x16xf32>
    %c0_1 = arith.constant 0 : index
    %c0_2 = arith.constant 0 : index
    %1 = vector.load %arg2[%c0_1, %c0_2] : memref<128x16xf32, #tpu.memory_space<vmem>>, vector<128x16xf32>
    %cst = arith.constant dense<0.000000e+00> : vector<8x128xf32>
    %2 = tpu.matmul %0, %1, %cst {dimension_numbers = #tpu.dot_dimension_numbers<[1], [1], [0], [0], [0, 0, 1, 0], [], []>} : vector<8x16xf32>, vector<128x16xf32>, vector<8x128xf32> -> vector<8x128xf32>
    %c0_3 = arith.constant 0 : index
    %c0_4 = arith.constant 0 : index
    %3 = vector.load %arg3[%c0_3, %c0_4] : memref<1x128xf32, #tpu.memory_space<vmem>>, vector<1x128xf32>
    %4 = vector.broadcast %3 : vector<1x128xf32> to vector<8x128xf32>
    %5 = arith.addf %2, %4 : vector<8x128xf32>
    %6 = math.absf %5 : vector<8x128xf32>
    %cst_5 = arith.constant 0.000000e+00 : f32
    %7 = vector.broadcast %cst_5 : f32 to vector<8x128xf32>
    %8 = arith.subf %7, %6 : vector<8x128xf32>
    %9 = math.exp %8 : vector<8x128xf32>
    %cst_6 = arith.constant 0.000000e+00 : f32
    %10 = vector.broadcast %cst_6 : f32 to vector<8x128xf32>
    %11 = arith.cmpf oge, %5, %10 : vector<8x128xf32>
    %cst_7 = arith.constant 1.000000e+00 : f32
    %12 = vector.broadcast %cst_7 : f32 to vector<8x128xf32>
    %13 = arith.select %11, %12, %9 : vector<8x128xi1>, vector<8x128xf32>
    %cst_8 = arith.constant 1.000000e+00 : f32
    %14 = vector.broadcast %cst_8 : f32 to vector<8x128xf32>
    %15 = arith.addf %14, %9 : vector<8x128xf32>
    %16 = tpu.reciprocal %15 {approx = true} : vector<8x128xf32> -> vector<8x128xf32>
    %17 = arith.mulf %13, %16 : vector<8x128xf32>
    %c0_9 = arith.constant 0 : index
    %c0_10 = arith.constant 0 : index
    %18 = vector.load %arg4[%c0_9, %c0_10] : memref<8x128xf32, #tpu.memory_space<vmem>>, vector<8x128xf32>
    tpu.vector_store %arg4[%c0_9, %c0_10], %17 {strides = array<i32>} : memref<8x128xf32, #tpu.memory_space<vmem>>, vector<8x128xf32>,
    return
  }
  func.func @transform_0(%arg0: i32) -> (i32, i32) {
    %c0_i32 = arith.constant 0 : i32
    %c0_i32_0 = arith.constant 0 : i32
    return %arg0, %c0_i32 : i32, i32
  }
  func.func @transform_1(%arg0: i32) -> (i32, i32) {
    %c0_i32 = arith.constant 0 : i32
    %c0_i32_0 = arith.constant 0 : i32
    %c0_i32_1 = arith.constant 0 : i32
    return %c0_i32, %c0_i32_0 : i32, i32
  }
  func.func @transform_2(%arg0: i32) -> (i32, i32) {
    %c0_i32 = arith.constant 0 : i32
    %c0_i32_0 = arith.constant 0 : i32
    %c0_i32_1 = arith.constant 0 : i32
    return %c0_i32, %c0_i32_0 : i32, i32
  }
  func.func @transform_3(%arg0: i32) -> (i32, i32) {
    %c0_i32 = arith.constant 0 : i32
    %c0_i32_0 = arith.constant 0 : i32
    return %arg0, %c0_i32 : i32, i32
  }
}

</mosaic_0001>

<bundles_post_ra>
// kernel: tpu_custom_call.1
= control target key start
LH: loop header
LB: loop body
LE: loop exit
PB: predicated region body
PF: predicated region fallthrough
CT: control target
= control target key end

     0   :  { %vm36_vm0 = vcmask 130048   ;;  %s278_s0 = inlined_call_operand.vmem [shape: f32[8,16], index: 0, kind: input, shape index: {}]   ;;  %s279_s1 = inlined_call_operand.vmem [shape: f32[128,16], index: 1, kind: input, shape index: {}]   ;;  %s280_s2 = inlined_call_operand.vmem [shape: f32[1,128], index: 2, kind: input, shape index: {}]   ;;  %s281_s3 = inlined_call_operand.hbm [shape: f32[8,128], index: 3, kind: output, shape index: {}]  }
   0x1   :  { %v31_v0 = vld [vmem:[%s279_s1 + $0x78] sm:$0xff]  ;;  %v30_v1 = vld [vmem:[%s279_s1 + $0x70] sm:$0xff] }
   0x2   :  { %134 = vmatpush.xpose.msk.msra.mxu0 %vm36_vm0, %v31_v0 }
   0x3   :  { %8 = vsyncpa [#allocation3], 0  ;;  %v29_v2 = vld [vmem:[%s279_s1 + $0x68] sm:$0xff]  ;;  %v28_v3 = vld [vmem:[%s279_s1 + $0x60] sm:$0xff] }
   0x4   :  { %v27_v4 = vld [vmem:[%s279_s1 + $0x58] sm:$0xff]  ;;  %v26_v5 = vld [vmem:[%s279_s1 + $0x50] sm:$0xff]  ;;  %v25_v6 = vld [vmem:[%s279_s1 + $0x48] sm:$0xff] }
   0x5   :  { %v24_v7 = vld [vmem:[%s279_s1 + $0x40] sm:$0xff]  ;;  %v23_v8 = vld [vmem:[%s279_s1 + $0x38] sm:$0xff]  ;;  %v22_v9 = vld [vmem:[%s279_s1 + $0x30] sm:$0xff] }
   0x6   :  { %135 = vmatpush.xpose.msk.msra.mxu0 %vm36_vm0, %v30_v1  ;;  %v21_v10 = vld [vmem:[%s279_s1 + $0x28] sm:$0xff]  ;;  %v20_v11 = vld [vmem:[%s279_s1 + $0x20] sm:$0xff]  ;;  %v19_v12 = vld [vmem:[%s279_s1 + $0x18] sm:$0xff] }
   0x7   :  { %v18_v13 = vld [vmem:[%s279_s1 + $0x10] sm:$0xff]  ;;  %v17_v14 = vld [vmem:[%s279_s1 + $0x8] sm:$0xff]  ;;  %v16_v15 = vld [vmem:[%s279_s1] sm:$0xff]  ;;  %s183_s1 = smov [#allocation2]  }
   0x8   :  { %v15_v16 = vld [vmem:[%s278_s0] sm:$0xff]  ;;  %s123_s21 = sshll.u32 %s183_s1, 4  ;;  %s125_s0 = sshll.u32 %s281_s3, 4  ;;  %s124_s21 = int_to_ptr.vmem [resolvable:$true] %s123_s21  ;;  %s126_s0 = int_to_ptr.hbm [resolvable:$true] %s125_s0 }
   0x9   :  { %v152_v17 = vld [vmem:[%s280_s2] ss:$0 sm:$0xff] }
   0xa   :  { %136 = vmatpush.xpose.msk.msra.mxu0 %vm36_vm0, %v29_v2 }
   0xe   :  { %137 = vmatpush.xpose.msk.msra.mxu0 %vm36_vm0, %v28_v3 }
  0x12   :  { %138 = vmatpush.xpose.msk.msra.mxu0 %vm36_vm0, %v27_v4 }
  0x16   :  { %139 = vmatpush.xpose.msk.msra.mxu0 %vm36_vm0, %v26_v5 }
  0x1a   :  { %140 = vmatpush.xpose.msk.msra.mxu0 %vm36_vm0, %v25_v6 }
  0x1e   :  { %141 = vmatpush.xpose.msk.msra.mxu0 %vm36_vm0, %v24_v7 }
  0x22   :  { %142 = vmatpush.xpose.msk.msra.mxu0 %vm36_vm0, %v23_v8 }
  0x26   :  { %143 = vmatpush.xpose.msk.msra.mxu0 %vm36_vm0, %v22_v9 }
  0x2a   :  { %144 = vmatpush.xpose.msk.msra.mxu0 %vm36_vm0, %v21_v10 }
  0x2e   :  { %145 = vmatpush.xpose.msk.msra.mxu0 %vm36_vm0, %v20_v11 }
  0x32   :  { %146 = vmatpush.xpose.msk.msra.mxu0 %vm36_vm0, %v19_v12 }
  0x36   :  { %147 = vmatpush.xpose.msk.msra.mxu0 %vm36_vm0, %v18_v13 }
  0x3a   :  { %148 = vmatpush.xpose.msk.msra.mxu0 %vm36_vm0, %v17_v14 }
  0x3e   :  { %149 = vmatpush.xpose.msk.msra.mxu0 %vm36_vm0, %v16_v15 }
  0x41   :  { %150 = vmatmul.msk.f32.vlgmr.msra.gmra.mxu0 %vm36_vm0, %v15_v16 }
  0xbe   :  { %v105_v18 = vpop.f32.mrf.mxu0 }
  0xbf   :  { %v106_v19 = vadd.f32 %v152_v17, %v105_v18 }
  0xc1   :  { %v108_v20 = vand.u32 2147483647, %v106_v19  ;;  %vm112_vm1 = vcmp.ge.f32.partialorder %v106_v19, 0.0 }
  0xc3   :  { %v109_v21 = vsub.f32 0.0, %v108_v20 }
  0xc5   :  { %v110_v22 = vmul.f32 1.442695, %v109_v21 }
  0xc7   :  { %153 = vpow2.f32 %v110_v22 }
  0xcd   :  { %v154_v23 = vpop.eup %153 }
  0xce   :  { %v114_v24 = vadd.f32 1.0, %v154_v23  ;;  %v113_v26 = vsel %vm112_vm1, 1.0, %v154_v23 }
  0xd0   :  { %155 = vrcp.f32 %v114_v24 }
  0xd6   :  { %v156_v25 = vpop.eup %155 }
  0xd7   :  { %v116_v27 = vmul.f32 %v156_v25, %v113_v26 }
  0xd9   :  { %117 = vst [vmem:[#allocation2] sm:$0xff] %v116_v27 }
  0xda   :  { %128 = dma.vmem_to_hbm [thread:$0]  %s124_s21, 128, %s126_s0, [#allocation3]  }
  0xdb   :  { %181 = dma.done.wait [#allocation3], 128  }
  0xdc   :  { %182 = vsyncadd [#allocation3], 4294967168 }
  0xdd   :  { %133 = vsyncpa [#allocation3], 1 }

</bundles_post_ra>
